<compile_context>
chip_gen: v7x
topology: tpu7x:2x2x1
jax: 0.10.0
libtpu: 0.0.40
codegen_flags: <defaults>
</compile_context>

<pallas_src>
import functools
import math

import jax
import jax.numpy as jnp
from jax.experimental import pallas as pl
from jax.experimental.pallas import tpu as pltpu


def _patch_embed_kernel(x_ref, w_ref, pos_ref, o_ref, *, images_per_tile=1):
    """One row-tile of flattened patches -> embedded tokens.

    x_ref:   (TM, Dp)        bf16 flattened patches (feature order c, ph, pw)
    w_ref:   (Dp, E)         bf16 patch_embed weight, transposed (x @ W form)
    pos_ref: (TM, E)/(N, E)  f32 pos_embed + folded Linear bias
    o_ref:   (TM, E)         output tokens
    """
    acc = jnp.dot(x_ref[...], w_ref[...], preferred_element_type=jnp.float32)
    if images_per_tile > 1:
        # pos_ref holds one image's (N, E) table; broadcast it over the
        # images_per_tile images in this row tile.  Row-dim-only reshape
        # (wrapper guarantees N % 8 == 0 here), no lane crossing.
        k = images_per_tile
        tm, e = acc.shape
        n = tm // k
        acc = (acc.reshape(k, n, e) + pos_ref[...][None, :, :]).reshape(tm, e)
    else:
        acc = acc + pos_ref[...]
    o_ref[...] = acc.astype(o_ref.dtype)


def extract_patches(x, patch_size):
    """[B, C, H, W] -> [B, N, C*P*P], matching torch unfold/permute/flatten."""
    B, C, H, W = x.shape
    P = patch_size
    x = x.reshape(B, C, H // P, P, W // P, P)
    x = jnp.transpose(x, (0, 2, 4, 1, 3, 5))          # (B, hp, wp, C, ph, pw)
    return x.reshape(B, (H // P) * (W // P), C * P * P)


def _scoped_vmem_cap():
    """Generation-aware scoped-VMEM cap in bytes."""
    kind = ""
    try:
        kind = (jax.devices()[0].device_kind or "").lower()
    except Exception:
        pass
    if "v7" in kind:
        return 48 << 20          # v7x: 64 MiB physical VMEM per TensorCore
    return 100 << 20             # v5e / v6e: 128 MiB


def _row_tile_target(Dp, E, N, cd, od, cap):
    """Max rows per grid step keeping the working set within ~70% of cap."""
    budget = int(0.70 * cap)
    fixed = 2 * Dp * E * cd + 2 * N * E * 4              # weight + resident pos (worst case)
    per_row = 2 * Dp * cd + 2 * E * od + 4 * E + 4 * E   # x, out, streamed pos, f32 acc
    rows = max(budget - fixed, 16 * per_row) // per_row
    return int(max(16, min(2048, (rows // 16) * 16)))


def _choose_row_tile(M, N, B, target):
    """Rows of the flattened [B*N] patch axis handled per grid step.

    Returns (tm, images_per_tile) where images_per_tile is an int k when
    tm == k*N (whole images per step) and None when tm is a divisor of N.
    Hard legality constraint: tm % 8 == 0 or tm == M (sublane rule on the
    second-minor block dim).
    """
    def legal(tm, a):
        return tm % a == 0 or tm == M

    if N <= target:
        # Whole images per step: prefer 16-row alignment (bf16 sublane
        # packing), prefer >= 2 grid points (megacore / DMA-compute overlap),
        # otherwise take the largest k that fits the VMEM-derived target.
        k_hi = max(1, min(B, target // N))
        k_mc = max(1, min(k_hi, -(-B // 2)))      # ceil(B/2): keep >= 2 grid points
        for hi in (k_mc, k_hi):
            for a in (16, 8):
                for k in range(hi, 0, -1):
                    if legal(k * N, a):
                        return k * N, k
        # No aligned k under the target: smallest aligned k above it (may
        # exceed the target; correctness first).
        for k in range(k_hi + 1, B + 1):
            if legal(k * N, 8):
                return k * N, k
    else:
        # One image exceeds the target: take an aligned divisor of N so the
        # positional embedding stays phase-aligned (index_map i % (N // tm)).
        for a in (16, 8):
            for d in range(min(target, N), 0, -1):
                if N % d == 0 and d % a == 0:
                    return d, None
        # No aligned divisor of N: fall back to whole-image tiles.
        for k in range(1, B + 1):
            if legal(k * N, 8):
                return k * N, k
    return M, B   # tm == M is always legal


def image_patcher(x, weight, bias, pos_embed, *, patch_size,
                  compute_dtype=jnp.bfloat16, out_dtype=jnp.bfloat16,
                  single_buffer_consts=True):
    """
    x:         [B, C, H, W]   (NCHW, like the PyTorch module)
    weight:    [E, Dp]        (nn.Linear convention)
    bias:      [E]
    pos_embed: [1, N, E]
    returns:   [B, N, E] in out_dtype (bf16 by default)
    """
    B, C, H, W = x.shape
    E, Dp = weight.shape
    P = patch_size
    assert H % P == 0 and W % P == 0, "image size must be divisible by patch size"
    assert Dp == C * P * P, "weight in-features must equal C*P*P"
    N = (H // P) * (W // P)
    M = B * N

    cd = jnp.dtype(compute_dtype).itemsize
    od = jnp.dtype(out_dtype).itemsize
    cap = _scoped_vmem_cap()
    target = _row_tile_target(Dp, E, N, cd, od, cap)
    tm, k = _choose_row_tile(M, N, B, target)
    grid_m = pl.cdiv(M, tm)

    # --- HBM-side prep ------------------------------------------------------
    # TODO(synk): fuse this extraction pass into the kernel (see header note);
    # for now the bf16 cast is fused into the single XLA transpose pass.
    patches = extract_patches(x.astype(compute_dtype), P).reshape(M, Dp)
    w_t = weight.T.astype(compute_dtype)                       # (Dp, E): x @ W form
    # Fold the Linear bias into the positional embedding (one f32 add in-kernel).
    pos_bias = (pos_embed.reshape(N, E) + bias.reshape(1, E)).astype(jnp.float32)

    # Constant-index_map inputs do not need a second pipeline buffer.
    const = dict(pipeline_mode=pl.Buffered(1)) if single_buffer_consts else {}

    images_per_tile = 1
    if k is not None and N % 8 == 0:
        # Whole images per tile: pass the (N, E) table once, broadcast in-kernel.
        images_per_tile = k
        pos_arr = pos_bias
        pos_spec = pl.BlockSpec((N, E), lambda i: (0, 0), **const)
        pos_rows, pos_bufs = N, (1 if single_buffer_consts else 2)
    elif k is not None:
        # N not sublane-aligned (e.g. 196): replicate once in the wrapper.
        pos_arr = jnp.tile(pos_bias, (k, 1))                   # (tm, E)
        pos_spec = pl.BlockSpec((tm, E), lambda i: (0, 0), **const)
        pos_rows, pos_bufs = tm, (1 if single_buffer_consts else 2)
    else:
        # Sub-image tiles (tm | N): stream the phase-aligned pos block.
        nt = N // tm
        pos_arr = pos_bias
        pos_spec = pl.BlockSpec((tm, E), lambda i: (i % nt, 0))
        pos_rows, pos_bufs = tm, 2

    # --- explicit VMEM budget (matters on v7x's 64 MiB) ----------------------
    w_bufs = 1 if single_buffer_consts else 2
    working = (2 * tm * Dp * cd              # double-buffered streaming patch tile
               + 2 * tm * E * od             # double-buffered streaming output tile
               + w_bufs * Dp * E * cd        # resident weight
               + pos_bufs * pos_rows * E * 4  # pos(+bias), f32
               + tm * E * 4)                 # f32 matmul result before the cast
    vmem_limit = min(cap, max(32 << 20, int(1.25 * working)))

    kernel = functools.partial(_patch_embed_kernel, images_per_tile=images_per_tile)

    out_flat = pl.pallas_call(
        kernel,
        out_shape=jax.ShapeDtypeStruct((M, E), out_dtype),
        grid_spec=pltpu.PrefetchScalarGridSpec(
            num_scalar_prefetch=0,
            grid=(grid_m,),
            in_specs=[
                # NOTE: if profiling shows exposed DMA, sweep
                # pipeline_mode=pl.Buffered(3) on this streaming spec (and the
                # out_spec) before shrinking the tile.
                pl.BlockSpec((tm, Dp), lambda i: (i, 0)),
                pl.BlockSpec((Dp, E), lambda i: (0, 0), **const),
                pos_spec,
            ],
            out_specs=pl.BlockSpec((tm, E), lambda i: (i, 0)),
        ),
        compiler_params=pltpu.CompilerParams(
            dimension_semantics=("parallel",),
            vmem_limit_bytes=vmem_limit,
        ),
    )(patches, w_t, pos_arr)
    return out_flat.reshape(B, N, E)


def reference(x, weight, bias, pos_embed, patch_size):
    patches = extract_patches(x, patch_size)
    return patches @ weight.T + bias + pos_embed


if __name__ == "__main__":
    # Small shapes consistent with the module; Dp = C*P*P = 128 and E = 256
    # keep loads/stores lane-dense and the MXU K dimension full; batch 4 so
    # the parallel grid has 2 points and the in-kernel pos broadcast is used.
    B, C, H, W = 4, 8, 16, 16
    patch_size = 4
    embed_dim = 256
    num_patches = (H // patch_size) * (W // patch_size)    # 16
    patch_dim = C * patch_size * patch_size                # 128

    key = jax.random.PRNGKey(0)
    kx, kw, kb, kp = jax.random.split(key, 4)

    x = jax.random.normal(kx, (B, C, H, W), dtype=jnp.float32)
    # nn.Linear default init: U(-1/sqrt(in), 1/sqrt(in))
    bound = 1.0 / math.sqrt(patch_dim)
    weight = jax.random.uniform(kw, (embed_dim, patch_dim),
                                minval=-bound, maxval=bound, dtype=jnp.float32)
    bias = jax.random.uniform(kb, (embed_dim,),
                              minval=-bound, maxval=bound, dtype=jnp.float32)
    # nn.Parameter(torch.randn(...))
    pos_embed = jax.random.normal(kp, (1, num_patches, embed_dim),
                                  dtype=jnp.float32)

    def build(single_buffer_consts):
        return jax.jit(functools.partial(image_patcher, patch_size=patch_size,
                                         single_buffer_consts=single_buffer_consts))

    try:
        out = jax.block_until_ready(build(True)(x, weight, bias, pos_embed))
    except Exception:
        # Fallback for jax builds that reject BlockSpec.pipeline_mode: default
        # double buffering of the constant-index inputs.
        out = jax.block_until_ready(build(False)(x, weight, bias, pos_embed))

    ref = reference(x, weight, bias, pos_embed, patch_size)
    assert out.shape == (B, num_patches, embed_dim)
    # bf16 matmul streams + bf16 output with f32 MXU accumulation vs. an
    # all-f32 reference.
    err = float(jnp.max(jnp.abs(out.astype(jnp.float32) - ref)))
    assert jnp.allclose(out.astype(jnp.float32), ref, atol=6e-2, rtol=6e-2), err

    print("KERNEL_OK")
</pallas_src>

<mosaic_0001>
module attributes {stable_mosaic.version = 11 : i64} {
  func.func @_patch_embed_kernel(%arg0: i32, %arg1: memref<32x128xbf16, #tpu.memory_space<vmem>>, %arg2: memref<128x256xbf16, #tpu.memory_space<vmem>>, %arg3: memref<16x256xf32, #tpu.memory_space<vmem>>, %arg4: memref<32x256xbf16, #tpu.memory_space<vmem>>) attributes {dimension_semantics = [#tpu.dimension_semantics<parallel>], iteration_bounds = array<i64: 2>, scalar_prefetch = 0 : i64, scratch_operands = 0 : i64, tpu.core_type = #tpu.core_type<tc>, window_params = [{transform_indices = @transform_0, window_bounds = array<i64: 32, 128>}, {pipeline_mode = #tpu.pipeline_mode<synchronous>, transform_indices = @transform_1, window_bounds = array<i64: 128, 256>}, {pipeline_mode = #tpu.pipeline_mode<synchronous>, transform_indices = @transform_2, window_bounds = array<i64: 16, 256>}, {transform_indices = @transform_3, window_bounds = array<i64: 32, 256>}]} {
    %c0 = arith.constant 0 : index
    %c0_0 = arith.constant 0 : index
    %0 = vector.load %arg1[%c0, %c0_0] : memref<32x128xbf16, #tpu.memory_space<vmem>>, vector<32x128xbf16>
    %c0_1 = arith.constant 0 : index
    %c0_2 = arith.constant 0 : index
    %1 = vector.load %arg2[%c0_1, %c0_2] : memref<128x256xbf16, #tpu.memory_space<vmem>>, vector<128x256xbf16>
    %cst = arith.constant dense<0.000000e+00> : vector<32x256xf32>
    %2 = tpu.matmul %0, %1, %cst {dimension_numbers = #tpu.dot_dimension_numbers<[1], [0], [0], [1], [0, 0, 1, 1], [], []>} : vector<32x128xbf16>, vector<128x256xbf16>, vector<32x256xf32> -> vector<32x256xf32>
    %3 = vector.shape_cast %2 : vector<32x256xf32> to vector<2x16x256xf32>
    %c0_3 = arith.constant 0 : index
    %c0_4 = arith.constant 0 : index
    %4 = vector.load %arg3[%c0_3, %c0_4] : memref<16x256xf32, #tpu.memory_space<vmem>>, vector<16x256xf32>
    %5 = vector.shape_cast %4 : vector<16x256xf32> to vector<1x16x256xf32>
    %6 = vector.broadcast %5 : vector<1x16x256xf32> to vector<2x16x256xf32>
    %7 = arith.addf %3, %6 : vector<2x16x256xf32>
    %8 = vector.shape_cast %7 : vector<2x16x256xf32> to vector<32x256xf32>
    %9 = arith.truncf %8 : vector<32x256xf32> to vector<32x256xbf16>
    %c0_5 = arith.constant 0 : index
    %c0_6 = arith.constant 0 : index
    %10 = vector.load %arg4[%c0_5, %c0_6] : memref<32x256xbf16, #tpu.memory_space<vmem>>, vector<32x256xbf16>
    tpu.vector_store %arg4[%c0_5, %c0_6], %9 {strides = array<i32>} : memref<32x256xbf16, #tpu.memory_space<vmem>>, vector<32x256xbf16>,
    return
  }
  func.func @transform_0(%arg0: i32) -> (i32, i32) {
    %c0_i32 = arith.constant 0 : i32
    %c0_i32_0 = arith.constant 0 : i32
    return %arg0, %c0_i32 : i32, i32
  }
  func.func @transform_1(%arg0: i32) -> (i32, i32) {
    %c0_i32 = arith.constant 0 : i32
    %c0_i32_0 = arith.constant 0 : i32
    %c0_i32_1 = arith.constant 0 : i32
    return %c0_i32, %c0_i32_0 : i32, i32
  }
  func.func @transform_2(%arg0: i32) -> (i32, i32) {
    %c0_i32 = arith.constant 0 : i32
    %c0_i32_0 = arith.constant 0 : i32
    %c0_i32_1 = arith.constant 0 : i32
    return %c0_i32, %c0_i32_0 : i32, i32
  }
  func.func @transform_3(%arg0: i32) -> (i32, i32) {
    %c0_i32 = arith.constant 0 : i32
    %c0_i32_0 = arith.constant 0 : i32
    return %arg0, %c0_i32 : i32, i32
  }
}

module attributes {stable_mosaic.version = 11 : i64} {
  func.func @_patch_embed_kernel(%arg0: i32, %arg1: memref<32x128xbf16, #tpu.memory_space<vmem>>, %arg2: memref<128x256xbf16, #tpu.memory_space<vmem>>, %arg3: memref<16x256xf32, #tpu.memory_space<vmem>>, %arg4: memref<32x256xbf16, #tpu.memory_space<vmem>>) attributes {dimension_semantics = [#tpu.dimension_semantics<parallel>], iteration_bounds = array<i64: 2>, scalar_prefetch = 0 : i64, scratch_operands = 0 : i64, tpu.core_type = #tpu.core_type<tc>, window_params = [{transform_indices = @transform_0, window_bounds = array<i64: 32, 128>}, {pipeline_mode = #tpu.pipeline_mode<synchronous>, transform_indices = @transform_1, window_bounds = array<i64: 128, 256>}, {pipeline_mode = #tpu.pipeline_mode<synchronous>, transform_indices = @transform_2, window_bounds = array<i64: 16, 256>}, {transform_indices = @transform_3, window_bounds = array<i64: 32, 256>}]} {
    %c0 = arith.constant 0 : index
    %c0_0 = arith.constant 0 : index
    %0 = vector.load %arg1[%c0, %c0_0] : memref<32x128xbf16, #tpu.memory_space<vmem>>, vector<32x128xbf16>
    %c0_1 = arith.constant 0 : index
    %c0_2 = arith.constant 0 : index
    %1 = vector.load %arg2[%c0_1, %c0_2] : memref<128x256xbf16, #tpu.memory_space<vmem>>, vector<128x256xbf16>
    %cst = arith.constant dense<0.000000e+00> : vector<32x256xf32>
    %2 = tpu.matmul %0, %1, %cst {dimension_numbers = #tpu.dot_dimension_numbers<[1], [0], [0], [1], [0, 0, 1, 1], [], []>} : vector<32x128xbf16>, vector<128x256xbf16>, vector<32x256xf32> -> vector<32x256xf32>
    %3 = vector.shape_cast %2 : vector<32x256xf32> to vector<2x16x256xf32>
    %c0_3 = arith.constant 0 : index
    %c0_4 = arith.constant 0 : index
    %4 = vector.load %arg3[%c0_3, %c0_4] : memref<16x256xf32, #tpu.memory_space<vmem>>, vector<16x256xf32>
    %5 = vector.shape_cast %4 : vector<16x256xf32> to vector<1x16x256xf32>
    %6 = vector.broadcast %5 : vector<1x16x256xf32> to vector<2x16x256xf32>
    %7 = arith.addf %3, %6 : vector<2x16x256xf32>
    %8 = vector.shape_cast %7 : vector<2x16x256xf32> to vector<32x256xf32>
    %9 = arith.truncf %8 : vector<32x256xf32> to vector<32x256xbf16>
    %c0_5 = arith.constant 0 : index
    %c0_6 = arith.constant 0 : index
    %10 = vector.load %arg4[%c0_5, %c0_6] : memref<32x256xbf16, #tpu.memory_space<vmem>>, vector<32x256xbf16>
    tpu.vector_store %arg4[%c0_5, %c0_6], %9 {strides = array<i32>} : memref<32x256xbf16, #tpu.memory_space<vmem>>, vector<32x256xbf16>,
    return
  }
  func.func @transform_0(%arg0: i32) -> (i32, i32) {
    %c0_i32 = arith.constant 0 : i32
    %c0_i32_0 = arith.constant 0 : i32
    return %arg0, %c0_i32 : i32, i32
  }
  func.func @transform_1(%arg0: i32) -> (i32, i32) {
    %c0_i32 = arith.constant 0 : i32
    %c0_i32_0 = arith.constant 0 : i32
    %c0_i32_1 = arith.constant 0 : i32
    return %c0_i32, %c0_i32_0 : i32, i32
  }
  func.func @transform_2(%arg0: i32) -> (i32, i32) {
    %c0_i32 = arith.constant 0 : i32
    %c0_i32_0 = arith.constant 0 : i32
    %c0_i32_1 = arith.constant 0 : i32
    return %c0_i32, %c0_i32_0 : i32, i32
  }
  func.func @transform_3(%arg0: i32) -> (i32, i32) {
    %c0_i32 = arith.constant 0 : i32
    %c0_i32_0 = arith.constant 0 : i32
    return %arg0, %c0_i32 : i32, i32
  }
}

</mosaic_0001>

<bundles_post_ra>
// kernel: image_patcher.1
= control target key start
LH: loop header
LB: loop body
LE: loop exit
PB: predicated region body
PF: predicated region fallthrough
CT: control target
= control target key end

     0   :  { %8 = vsyncpa [#allocation3], 0  ;;  %s838_s0 = inlined_call_operand.vmem [shape: bf16[64,128], index: 0, kind: input, shape index: {}]   ;;  %s839_s1 = inlined_call_operand.vmem [shape: bf16[128,256], index: 1, kind: input, shape index: {}]   ;;  %s840_s2 = inlined_call_operand.vmem [shape: f32[16,256], index: 2, kind: input, shape index: {}]   ;;  %s841_s3 = inlined_call_operand.hbm [shape: bf16[64,256], index: 3, kind: output, shape index: {}]  }
   0x1   :  { %10 = vsyncpa [#allocation3 + $0x1], 0  ;;  %s668_s12 = smov 0   ;;  %s670_s13 = smov 0  }
   0x2   :  { %s672_s14 = smov 0   ;;  %s674_s15 = smov 0  }
   0x3 LB: > { %s689_s16 = sadd.s32 4294967295, %s642_s15   ;;  %s455_s17 = sadd.s32 4294967294, %s642_s15   ;;  %s642_s15 = sphi %s674_s15, %s847_s15   ;;  %s638_s14 = sphi %s672_s14, %s846_s14   ;;  %s634_s13 = sphi %s670_s13, %s845_s13   ;;  %s630_s12 = sphi %s668_s12, %s844_s12  }
   0x4   : > { %s693_s18 = sadd.s32 1, %s642_s15   ;;  %s91_s19 = sadd.s32 1, %s638_s14 }
   0x5   : > { %s88_s20 = ssub.s32 %s642_s15, %s693_s18  ;;  %p101_p0 = scmp.ne.s32.totalorder %s638_s14, %s634_s13 }
   0x6   : > { %p89_p1 = scmp.eq.s32.totalorder %s88_s20, 0  ;;  %p102_p2 = scmp.eq.s32.totalorder %s689_s16, 1 }
   0x7   : > { %p107_p3 = scmp.ne.s32.totalorder %s634_s13, %s630_s12  ;;  %p108_p4 = scmp.eq.s32.totalorder %s455_s17, 1 }
   0x8   : > { %s704_s21 = scalar_select %p89_p1, %s638_s14, %s91_s19  }
   0x9   : > { %p706_p5 = por %p102_p2, %p101_p0  ;;  %p710_p6 = por %p108_p4, %p107_p3 }
   0xa   : > { %p458_p7 = scmp.ge.s32.totalorder %s642_s15, 1  ;;  %p141_p8 = scmp.lt.s32.totalorder %s642_s15, 3 }
   0xc   : > { %p142_p9 = pnand %p458_p7, %p141_p8 }
   0xd   : > { %v554_v0 = vld [vmem:[%s839_s1 + $0x4] ss:$8 sps:$4 sm:$0xff] (!%p142_p9)   ;;  %s460_s26 = sshll.u32 (!%p142_p9), %s689_s16, 2  ;;  %v556_v1 = vld [vmem:[%s839_s1] ss:$8 sps:$4 sm:$0xff] (!%p142_p9)   ;;  %v644_v2 = vmov (!%p142_p9), 0  }
   0xe   : > { %145 = sbr.rel (%p142_p9) target bundleno = 281 (0x119), region = 32  ;;  %317 = vmatprep.mubr.bf16.mxu0 (!%p142_p9), %v644_v2  ;;  %327 = vmatprep.mubr.bf16.mxu1 (!%p142_p9), %v644_v2  ;;  %p166_p10 = scmp.lt.s32.totalorder (!%p142_p9), %s460_s26, 7  ;;  %v557_v3 = vld [vmem:[%s839_s1 + $0x14] ss:$8 sps:$4 sm:$0xff] (!%p142_p9)   ;;  %v559_v4 = vld [vmem:[%s839_s1 + $0x10] ss:$8 sps:$4 sm:$0xff] (!%p142_p9)  }
   0xf   : > { %285 = vmatprep.subr.bf16.mxu0 (!%p142_p9), %v554_v0  ;;  %496 = vmatprep.subr.bf16.mxu1 (!%p142_p9), %v554_v0  ;;  %v560_v5 = vld [vmem:[%s839_s1 + $0x24] ss:$8 sps:$4 sm:$0xff] (!%p142_p9)   ;;  %v562_v6 = vld [vmem:[%s839_s1 + $0x20] ss:$8 sps:$4 sm:$0xff] (!%p142_p9)   ;;  %v563_v7 = vld [vmem:[%s839_s1 + $0x34] ss:$8 sps:$4 sm:$0xff] (!%p142_p9)  }
  0x10   : > { %286 = vmatpush1.bf16.msra.mxu0 (!%p142_p9), %v556_v1  ;;  %504 = vmatpush1.bf16.msra.mxu1 (!%p142_p9), %v556_v1  ;;  %v565_v8 = vld [vmem:[%s839_s1 + $0x30] ss:$8 sps:$4 sm:$0xff] (!%p142_p9)   ;;  %v566_v9 = vld [vmem:[%s839_s1 + $0x44] ss:$8 sps:$4 sm:$0xff] (!%p142_p9)   ;;  %v568_v10 = vld [vmem:[%s839_s1 + $0x40] ss:$8 sps:$4 sm:$0xff] (!%p142_p9)  }
  0x11   : > { %287 = vmatprep.subr.bf16.mxu0 (!%p142_p9), %v557_v3  ;;  %497 = vmatprep.subr.bf16.mxu1 (!%p142_p9), %v557_v3  ;;  %v569_v11 = vld [vmem:[%s839_s1 + $0x54] ss:$8 sps:$4 sm:$0xff] (!%p142_p9)   ;;  %v571_v12 = vld [vmem:[%s839_s1 + $0x50] ss:$8 sps:$4 sm:$0xff] (!%p142_p9)   ;;  %v572_v13 = vld [vmem:[%s839_s1 + $0x64] ss:$8 sps:$4 sm:$0xff] (!%p142_p9)  }
  0x12   : > { %v574_v14 = vld [vmem:[%s839_s1 + $0x60] ss:$8 sps:$4 sm:$0xff] (!%p142_p9)   ;;  %v575_v15 = vld [vmem:[%s839_s1 + $0x74] ss:$8 sps:$4 sm:$0xff] (!%p142_p9)   ;;  %v577_v16 = vld [vmem:[%s839_s1 + $0x70] ss:$8 sps:$4 sm:$0xff] (!%p142_p9)  }
  0x13   : > { %v338_v19 = vld [vmem:[%s840_s2] sm:$0xff] (!%p142_p9)  ;;  %v339_v20 = vld [vmem:[%s840_s2 + $0x8] sm:$0xff] (!%p142_p9)  ;;  %v340_v23 = vld [vmem:[%s840_s2 + $0x10] sm:$0xff] (!%p142_p9)  ;;  %s495_s10 = sshll.u32 (!%p142_p9), %s689_s16, 9  ;;  %s645_s25 = smov (!%p142_p9), [#allocation2]  }
  0x14   : > { %288 = vmatpush1.bf16.msra.mxu0 (!%p142_p9), %v559_v4  ;;  %505 = vmatpush1.bf16.msra.mxu1 (!%p142_p9), %v559_v4  ;;  %v341_v28 = vld [vmem:[%s840_s2 + $0x18] sm:$0xff] (!%p142_p9)  ;;  %s793_s19 = scalar_lea.hbm (!%p142_p9), %s841_s3, %s495_s10 }
  0x15   : > { %s849_s26 = smov (!%p166_p10, %s460_s26), 7  ;;  %289 = vmatprep.subr.bf16.mxu0 %v560_v5  ;;  %498 = vmatprep.subr.bf16.mxu1 %v560_v5 }
  0x16   : > { %s461_s8 = sshll.u32 %s849_s26, 2  ;;  %s162_s26 = sand.u32 1, %s634_s13  }
  0x17   : > { %s741_s24 = scalar_lea.vmem %s838_s0, %s461_s8  ;;  %s459_s27 = sshll.u32 %s162_s26, 5 }
  0x18   : > { %290 = vmatpush1.bf16.msra.mxu0 %v562_v6  ;;  %506 = vmatpush1.bf16.msra.mxu1 %v562_v6  ;;  %v578_v17 = vld [vmem:[%s741_s24] sm:$0xff]   ;;  %v579_v18 = vld [vmem:[%s741_s24 + $0x8] sm:$0xff]   ;;  %s164_s8 = scalar_lea.vmem [#allocation2], %s459_s27  ;;  %s797_s16 = scalar_lea.sflag [#allocation3], %s162_s26 }
  0x19   : > { %291 = vmatprep.subr.bf16.mxu0 %v563_v7  ;;  %499 = vmatprep.subr.bf16.mxu1 %v563_v7  ;;  %s393_s9 = sshll.u32 %s164_s8, 4  ;;  %s584_s27 = sshll.u32 %s645_s25, 4  ;;  %s788_s9 = int_to_ptr.vmem [resolvable:$true] %s393_s9  ;;  %s585_s27 = int_to_ptr.vmem [resolvable:$false] %s584_s27 }
  0x1a   : > { %s580_s20 = scalar_lea.vmem %s788_s9, 512  ;;  %s586_s28 = scalar_lea.vmem %s585_s27, 1024 }
  0x1b   : > { %p581_p11 = scmp.ne.s32.totalorder %s788_s9, %s580_s20  ;;  %p587_p0 = scmp.lt.s32.totalorder %s788_s9, %s585_s27 }
  0x1c   : > { %292 = vmatpush1.bf16.msra.mxu0 %v565_v8  ;;  %507 = vmatpush1.bf16.msra.mxu1 %v565_v8  ;;  %p588_p1 = scmp.lt.s32.totalorder %s586_s28, %s580_s20 }
  0x1d   : > { %293 = vmatprep.subr.bf16.mxu0 %v566_v9  ;;  %500 = vmatprep.subr.bf16.mxu1 %v566_v9  ;;  %p582_p12 = pnand %p581_p11, %p706_p5 }
  0x1e   : > { %p589_p2 = por %p588_p1, %p587_p0 }
  0x1f   : > { %p583_p13 = pneg %p582_p12 }
  0x20   : > { %294 = vmatpush1.bf16.msra.mxu0 %v568_v10  ;;  %508 = vmatpush1.bf16.msra.mxu1 %v568_v10 }
  0x21   : > { %295 = vmatprep.subr.bf16.mxu0 %v569_v11  ;;  %501 = vmatprep.subr.bf16.mxu1 %v569_v11  ;;  %p590_p3 = pnand %p589_p2, %p583_p13 }
  0x24   : > { %296 = vmatpush1.bf16.msra.mxu0 %v571_v12  ;;  %509 = vmatpush1.bf16.msra.mxu1 %v571_v12 }
  0x25   : > { %297 = vmatprep.subr.bf16.mxu0 %v572_v13  ;;  %502 = vmatprep.subr.bf16.mxu1 %v572_v13 }
  0x28   : > { %298 = vmatpush1.bf16.msra.mxu0 %v574_v14  ;;  %510 = vmatpush1.bf16.msra.mxu1 %v574_v14 }
  0x29   : > { %299 = vmatprep.subr.bf16.mxu0 %v575_v15  ;;  %503 = vmatprep.subr.bf16.mxu1 %v575_v15 }
  0x2c   : > { %300 = vmatpush1.bf16.msra.mxu0 %v577_v16  ;;  %511 = vmatpush1.bf16.msra.mxu1 %v577_v16 }
  0x2f   : > { %318 = vmatmul.mubr.bf16.vlgmr.msra.gmra.mrb[0].mxu0 %v578_v17  ;;  %328 = vmatmul.mubr.bf16.vlgmr.msra.gmra.mrb[0].mxu1 %v579_v18 }
 0x102   : > { %v319_v21 = vpop.f32.mrb[0].mxu0  ;;  %v329_v22 = vpop.f32.mrb[0].mxu1 }
 0x103   : > { %v342_v24 = vadd.f32 %v338_v19, %v319_v21  ;;  %v346_v25 = vadd.f32 %v338_v19, %v329_v22  ;;  %v321_v26 = vpop.f32.mrb[1].mxu0  ;;  %v331_v27 = vpop.f32.mrb[1].mxu1 }
 0x104   : > { %v343_v29 = vadd.f32 %v339_v20, %v321_v26  ;;  %v347_v30 = vadd.f32 %v339_v20, %v331_v27  ;;  %v323_v31 = vpop.f32.mrb[2].mxu0  ;;  %v333_v32 = vpop.f32.mrb[2].mxu1 }
 0x105   : > { %v344_v33 = vadd.f32 %v340_v23, %v323_v31  ;;  %v348_v34 = vadd.f32 %v340_v23, %v333_v32  ;;  %v325_v35 = vpop.f32.mrb[3].mxu0  ;;  %v335_v36 = vpop.f32.mrb[3].mxu1 }
 0x106   : > { %v490_v37 = vpack.c.bf16 %v343_v29, %v342_v24  ;;  %v492_v38 = vpack.c.bf16 %v347_v30, %v346_v25  ;;  %v345_v39 = vadd.f32 %v341_v28, %v325_v35  ;;  %v349_v40 = vadd.f32 %v341_v28, %v335_v36 }
 0x108   : > { %374 = vst [vmem:[%s164_s8] sm:$0xff] %v490_v37  ;;  %376 = vst [vmem:[%s164_s8 + $0x10] sm:$0xff] %v492_v38  ;;  %v491_v41 = vpack.c.bf16 %v345_v39, %v344_v33  ;;  %v493_v42 = vpack.c.bf16 %v349_v40, %v348_v34 }
 0x10a   : > { %375 = vst [vmem:[%s164_s8 + $0x8] sm:$0xff] %v491_v41  ;;  %377 = vst [vmem:[%s164_s8 + $0x18] sm:$0xff] %v493_v42 }
 0x10b   : > { %593 = shalt.err (!%p590_p3)
}
 0x10c   : > { %s594_s26 = scalar_lea.hbm %s793_s19, 512  ;;  %s598_s4 = scalar_lea.hbm %s841_s3, 1024 }
 0x10d   : > { %p595_p4 = scmp.ne.s32.totalorder %s793_s19, %s594_s26  ;;  %p599_p9 = scmp.lt.u32.totalorder %s793_s19, %s841_s3 }
 0x10e   : > { %p600_p10 = scmp.lt.u32.totalorder %s598_s4, %s594_s26  ;;  %p602_p12 = scmp.lt.u32.totalorder %s594_s26, %s793_s19 }
 0x10f   : > { %p596_p7 = pnand %p595_p4, %p706_p5 }
 0x110   : > { %p601_p11 = por %p600_p10, %p599_p9 }
 0x111   : > { %p597_p8 = pneg %p596_p7 }
 0x112   : > { %p603_p13 = por %p602_p12, %p601_p11 }
 0x114   : > { %p604_p0 = pnand %p603_p13, %p597_p8 }
 0x116   : > { %607 = shalt.err (!%p604_p0)
}
 0x117   : > { %s646_s6 = smov 128   ;;  %s647_s7 = smov 8  }
 0x118   : > { %512 = dma.vmem_to_hbm [thread:$0]  (%p706_p5), %s788_s9, 512, %s793_s19, %s797_s16, %s646_s6, %s646_s6, %s647_s7  }
 0x119 PF: > { %p518_p1 = scmp.ge.s32.totalorder %s642_s15, 2  ;;  %s408_s8 = sand.u32 1, %s630_s12  }
 0x11a   : > { %s409_s10 = scalar_lea.sflag [#allocation3], %s408_s8 }
 0x11b   : > { %p515_p2 = pnand %p518_p1, %p710_p6 }
 0x11d   : > { %625 = dma.done.wait (!%p515_p2), %s409_s10, 512  }
 0x11e   : > { %627 = vsyncadd (!%p515_p2), %s409_s10, 4294966784  ;;  %p13_p3 = scmp.ge.s32.totalorder %s693_s18, 4   ;;  %s844_s12 = smov %s634_s13 }
 0x11f   : > { %s845_s13 = smov %s638_s14  ;;  %s846_s14 = smov %s704_s21 }
 0x120   : > { %s847_s15 = smov %s693_s18  ;;  %15 = sbr.rel (!%p13_p3) target bundleno = 3 (0x3), region = 67 }
 0x127   :  { %414 = vsyncpa [#allocation3], 1 }
 0x128   :  { %416 = vsyncpa [#allocation3 + $0x1], 1 }

// kernel: image_patcher.1
= control target key start
LH: loop header
LB: loop body
LE: loop exit
PB: predicated region body
PF: predicated region fallthrough
CT: control target
= control target key end

     0   :  { %8 = vsyncpa [#allocation3], 0  ;;  %s838_s0 = inlined_call_operand.vmem [shape: bf16[64,128], index: 0, kind: input, shape index: {}]   ;;  %s839_s1 = inlined_call_operand.vmem [shape: bf16[128,256], index: 1, kind: input, shape index: {}]   ;;  %s840_s2 = inlined_call_operand.vmem [shape: f32[16,256], index: 2, kind: input, shape index: {}]   ;;  %s841_s3 = inlined_call_operand.hbm [shape: bf16[64,256], index: 3, kind: output, shape index: {}]  }
   0x1   :  { %10 = vsyncpa [#allocation3 + $0x1], 0  ;;  %s668_s12 = smov 0   ;;  %s670_s13 = smov 0  }
   0x2   :  { %s672_s14 = smov 0   ;;  %s674_s15 = smov 0  }
   0x3 LB: > { %s689_s16 = sadd.s32 4294967295, %s642_s15   ;;  %s455_s17 = sadd.s32 4294967294, %s642_s15   ;;  %s642_s15 = sphi %s674_s15, %s847_s15   ;;  %s638_s14 = sphi %s672_s14, %s846_s14   ;;  %s634_s13 = sphi %s670_s13, %s845_s13   ;;  %s630_s12 = sphi %s668_s12, %s844_s12  }
   0x4   : > { %s693_s18 = sadd.s32 1, %s642_s15   ;;  %s91_s19 = sadd.s32 1, %s638_s14 }
   0x5   : > { %s88_s20 = ssub.s32 %s642_s15, %s693_s18  ;;  %p101_p0 = scmp.ne.s32.totalorder %s638_s14, %s634_s13 }
   0x6   : > { %p89_p1 = scmp.eq.s32.totalorder %s88_s20, 0  ;;  %p102_p2 = scmp.eq.s32.totalorder %s689_s16, 1 }
   0x7   : > { %p107_p3 = scmp.ne.s32.totalorder %s634_s13, %s630_s12  ;;  %p108_p4 = scmp.eq.s32.totalorder %s455_s17, 1 }
   0x8   : > { %s704_s21 = scalar_select %p89_p1, %s638_s14, %s91_s19  }
   0x9   : > { %p706_p5 = por %p102_p2, %p101_p0  ;;  %p710_p6 = por %p108_p4, %p107_p3 }
   0xa   : > { %p458_p7 = scmp.ge.s32.totalorder %s642_s15, 1  ;;  %p141_p8 = scmp.lt.s32.totalorder %s642_s15, 3 }
   0xc   : > { %p142_p9 = pnand %p458_p7, %p141_p8 }
   0xd   : > { %v554_v0 = vld [vmem:[%s839_s1 + $0x4] ss:$8 sps:$4 sm:$0xff] (!%p142_p9)   ;;  %s460_s26 = sshll.u32 (!%p142_p9), %s689_s16, 2  ;;  %v556_v1 = vld [vmem:[%s839_s1] ss:$8 sps:$4 sm:$0xff] (!%p142_p9)   ;;  %v644_v2 = vmov (!%p142_p9), 0  }
   0xe   : > { %145 = sbr.rel (%p142_p9) target bundleno = 281 (0x119), region = 32  ;;  %317 = vmatprep.mubr.bf16.mxu0 (!%p142_p9), %v644_v2  ;;  %327 = vmatprep.mubr.bf16.mxu1 (!%p142_p9), %v644_v2  ;;  %p166_p10 = scmp.lt.s32.totalorder (!%p142_p9), %s460_s26, 7  ;;  %v557_v3 = vld [vmem:[%s839_s1 + $0x14] ss:$8 sps:$4 sm:$0xff] (!%p142_p9)   ;;  %v559_v4 = vld [vmem:[%s839_s1 + $0x10] ss:$8 sps:$4 sm:$0xff] (!%p142_p9)  }
   0xf   : > { %285 = vmatprep.subr.bf16.mxu0 (!%p142_p9), %v554_v0  ;;  %496 = vmatprep.subr.bf16.mxu1 (!%p142_p9), %v554_v0  ;;  %v560_v5 = vld [vmem:[%s839_s1 + $0x24] ss:$8 sps:$4 sm:$0xff] (!%p142_p9)   ;;  %v562_v6 = vld [vmem:[%s839_s1 + $0x20] ss:$8 sps:$4 sm:$0xff] (!%p142_p9)   ;;  %v563_v7 = vld [vmem:[%s839_s1 + $0x34] ss:$8 sps:$4 sm:$0xff] (!%p142_p9)  }
  0x10   : > { %286 = vmatpush1.bf16.msra.mxu0 (!%p142_p9), %v556_v1  ;;  %504 = vmatpush1.bf16.msra.mxu1 (!%p142_p9), %v556_v1  ;;  %v565_v8 = vld [vmem:[%s839_s1 + $0x30] ss:$8 sps:$4 sm:$0xff] (!%p142_p9)   ;;  %v566_v9 = vld [vmem:[%s839_s1 + $0x44] ss:$8 sps:$4 sm:$0xff] (!%p142_p9)   ;;  %v568_v10 = vld [vmem:[%s839_s1 + $0x40] ss:$8 sps:$4 sm:$0xff] (!%p142_p9)  }
  0x11   : > { %287 = vmatprep.subr.bf16.mxu0 (!%p142_p9), %v557_v3  ;;  %497 = vmatprep.subr.bf16.mxu1 (!%p142_p9), %v557_v3  ;;  %v569_v11 = vld [vmem:[%s839_s1 + $0x54] ss:$8 sps:$4 sm:$0xff] (!%p142_p9)   ;;  %v571_v12 = vld [vmem:[%s839_s1 + $0x50] ss:$8 sps:$4 sm:$0xff] (!%p142_p9)   ;;  %v572_v13 = vld [vmem:[%s839_s1 + $0x64] ss:$8 sps:$4 sm:$0xff] (!%p142_p9)  }
  0x12   : > { %v574_v14 = vld [vmem:[%s839_s1 + $0x60] ss:$8 sps:$4 sm:$0xff] (!%p142_p9)   ;;  %v575_v15 = vld [vmem:[%s839_s1 + $0x74] ss:$8 sps:$4 sm:$0xff] (!%p142_p9)   ;;  %v577_v16 = vld [vmem:[%s839_s1 + $0x70] ss:$8 sps:$4 sm:$0xff] (!%p142_p9)  }
  0x13   : > { %v338_v19 = vld [vmem:[%s840_s2] sm:$0xff] (!%p142_p9)  ;;  %v339_v20 = vld [vmem:[%s840_s2 + $0x8] sm:$0xff] (!%p142_p9)  ;;  %v340_v23 = vld [vmem:[%s840_s2 + $0x10] sm:$0xff] (!%p142_p9)  ;;  %s495_s10 = sshll.u32 (!%p142_p9), %s689_s16, 9  ;;  %s645_s25 = smov (!%p142_p9), [#allocation2]  }
  0x14   : > { %288 = vmatpush1.bf16.msra.mxu0 (!%p142_p9), %v559_v4  ;;  %505 = vmatpush1.bf16.msra.mxu1 (!%p142_p9), %v559_v4  ;;  %v341_v28 = vld [vmem:[%s840_s2 + $0x18] sm:$0xff] (!%p142_p9)  ;;  %s793_s19 = scalar_lea.hbm (!%p142_p9), %s841_s3, %s495_s10 }
  0x15   : > { %s849_s26 = smov (!%p166_p10, %s460_s26), 7  ;;  %289 = vmatprep.subr.bf16.mxu0 %v560_v5  ;;  %498 = vmatprep.subr.bf16.mxu1 %v560_v5 }
  0x16   : > { %s461_s8 = sshll.u32 %s849_s26, 2  ;;  %s162_s26 = sand.u32 1, %s634_s13  }
  0x17   : > { %s741_s24 = scalar_lea.vmem %s838_s0, %s461_s8  ;;  %s459_s27 = sshll.u32 %s162_s26, 5 }
  0x18   : > { %290 = vmatpush1.bf16.msra.mxu0 %v562_v6  ;;  %506 = vmatpush1.bf16.msra.mxu1 %v562_v6  ;;  %v578_v17 = vld [vmem:[%s741_s24] sm:$0xff]   ;;  %v579_v18 = vld [vmem:[%s741_s24 + $0x8] sm:$0xff]   ;;  %s164_s8 = scalar_lea.vmem [#allocation2], %s459_s27  ;;  %s797_s16 = scalar_lea.sflag [#allocation3], %s162_s26 }
  0x19   : > { %291 = vmatprep.subr.bf16.mxu0 %v563_v7  ;;  %499 = vmatprep.subr.bf16.mxu1 %v563_v7  ;;  %s393_s9 = sshll.u32 %s164_s8, 4  ;;  %s584_s27 = sshll.u32 %s645_s25, 4  ;;  %s788_s9 = int_to_ptr.vmem [resolvable:$true] %s393_s9  ;;  %s585_s27 = int_to_ptr.vmem [resolvable:$false] %s584_s27 }
  0x1a   : > { %s580_s20 = scalar_lea.vmem %s788_s9, 512  ;;  %s586_s28 = scalar_lea.vmem %s585_s27, 1024 }
  0x1b   : > { %p581_p11 = scmp.ne.s32.totalorder %s788_s9, %s580_s20  ;;  %p587_p0 = scmp.lt.s32.totalorder %s788_s9, %s585_s27 }
  0x1c   : > { %292 = vmatpush1.bf16.msra.mxu0 %v565_v8  ;;  %507 = vmatpush1.bf16.msra.mxu1 %v565_v8  ;;  %p588_p1 = scmp.lt.s32.totalorder %s586_s28, %s580_s20 }
  0x1d   : > { %293 = vmatprep.subr.bf16.mxu0 %v566_v9  ;;  %500 = vmatprep.subr.bf16.mxu1 %v566_v9  ;;  %p582_p12 = pnand %p581_p11, %p706_p5 }
  0x1e   : > { %p589_p2 = por %p588_p1, %p587_p0 }
  0x1f   : > { %p583_p13 = pneg %p582_p12 }
  0x20   : > { %294 = vmatpush1.bf16.msra.mxu0 %v568_v10  ;;  %508 = vmatpush1.bf16.msra.mxu1 %v568_v10 }
  0x21   : > { %295 = vmatprep.subr.bf16.mxu0 %v569_v11  ;;  %501 = vmatprep.subr.bf16.mxu1 %v569_v11  ;;  %p590_p3 = pnand %p589_p2, %p583_p13 }
  0x24   : > { %296 = vmatpush1.bf16.msra.mxu0 %v571_v12  ;;  %509 = vmatpush1.bf16.msra.mxu1 %v571_v12 }
  0x25   : > { %297 = vmatprep.subr.bf16.mxu0 %v572_v13  ;;  %502 = vmatprep.subr.bf16.mxu1 %v572_v13 }
  0x28   : > { %298 = vmatpush1.bf16.msra.mxu0 %v574_v14  ;;  %510 = vmatpush1.bf16.msra.mxu1 %v574_v14 }
  0x29   : > { %299 = vmatprep.subr.bf16.mxu0 %v575_v15  ;;  %503 = vmatprep.subr.bf16.mxu1 %v575_v15 }
  0x2c   : > { %300 = vmatpush1.bf16.msra.mxu0 %v577_v16  ;;  %511 = vmatpush1.bf16.msra.mxu1 %v577_v16 }
  0x2f   : > { %318 = vmatmul.mubr.bf16.vlgmr.msra.gmra.mrb[0].mxu0 %v578_v17  ;;  %328 = vmatmul.mubr.bf16.vlgmr.msra.gmra.mrb[0].mxu1 %v579_v18 }
 0x102   : > { %v319_v21 = vpop.f32.mrb[0].mxu0  ;;  %v329_v22 = vpop.f32.mrb[0].mxu1 }
 0x103   : > { %v342_v24 = vadd.f32 %v338_v19, %v319_v21  ;;  %v346_v25 = vadd.f32 %v338_v19, %v329_v22  ;;  %v321_v26 = vpop.f32.mrb[1].mxu0  ;;  %v331_v27 = vpop.f32.mrb[1].mxu1 }
 0x104   : > { %v343_v29 = vadd.f32 %v339_v20, %v321_v26  ;;  %v347_v30 = vadd.f32 %v339_v20, %v331_v27  ;;  %v323_v31 = vpop.f32.mrb[2].mxu0  ;;  %v333_v32 = vpop.f32.mrb[2].mxu1 }
 0x105   : > { %v344_v33 = vadd.f32 %v340_v23, %v323_v31  ;;  %v348_v34 = vadd.f32 %v340_v23, %v333_v32  ;;  %v325_v35 = vpop.f32.mrb[3].mxu0  ;;  %v335_v36 = vpop.f32.mrb[3].mxu1 }
 0x106   : > { %v490_v37 = vpack.c.bf16 %v343_v29, %v342_v24  ;;  %v492_v38 = vpack.c.bf16 %v347_v30, %v346_v25  ;;  %v345_v39 = vadd.f32 %v341_v28, %v325_v35  ;;  %v349_v40 = vadd.f32 %v341_v28, %v335_v36 }
 0x108   : > { %374 = vst [vmem:[%s164_s8] sm:$0xff] %v490_v37  ;;  %376 = vst [vmem:[%s164_s8 + $0x10] sm:$0xff] %v492_v38  ;;  %v491_v41 = vpack.c.bf16 %v345_v39, %v344_v33  ;;  %v493_v42 = vpack.c.bf16 %v349_v40, %v348_v34 }
 0x10a   : > { %375 = vst [vmem:[%s164_s8 + $0x8] sm:$0xff] %v491_v41  ;;  %377 = vst [vmem:[%s164_s8 + $0x18] sm:$0xff] %v493_v42 }
 0x10b   : > { %593 = shalt.err (!%p590_p3)
}
 0x10c   : > { %s594_s26 = scalar_lea.hbm %s793_s19, 512  ;;  %s598_s4 = scalar_lea.hbm %s841_s3, 1024 }
 0x10d   : > { %p595_p4 = scmp.ne.s32.totalorder %s793_s19, %s594_s26  ;;  %p599_p9 = scmp.lt.u32.totalorder %s793_s19, %s841_s3 }
 0x10e   : > { %p600_p10 = scmp.lt.u32.totalorder %s598_s4, %s594_s26  ;;  %p602_p12 = scmp.lt.u32.totalorder %s594_s26, %s793_s19 }
 0x10f   : > { %p596_p7 = pnand %p595_p4, %p706_p5 }
 0x110   : > { %p601_p11 = por %p600_p10, %p599_p9 }
 0x111   : > { %p597_p8 = pneg %p596_p7 }
 0x112   : > { %p603_p13 = por %p602_p12, %p601_p11 }
 0x114   : > { %p604_p0 = pnand %p603_p13, %p597_p8 }
 0x116   : > { %607 = shalt.err (!%p604_p0)
}
 0x117   : > { %s646_s6 = smov 128   ;;  %s647_s7 = smov 8  }
 0x118   : > { %512 = dma.vmem_to_hbm [thread:$0]  (%p706_p5), %s788_s9, 512, %s793_s19, %s797_s16, %s646_s6, %s646_s6, %s647_s7  }
 0x119 PF: > { %p518_p1 = scmp.ge.s32.totalorder %s642_s15, 2  ;;  %s408_s8 = sand.u32 1, %s630_s12  }
 0x11a   : > { %s409_s10 = scalar_lea.sflag [#allocation3], %s408_s8 }
 0x11b   : > { %p515_p2 = pnand %p518_p1, %p710_p6 }
 0x11d   : > { %625 = dma.done.wait (!%p515_p2), %s409_s10, 512  }
 0x11e   : > { %627 = vsyncadd (!%p515_p2), %s409_s10, 4294966784  ;;  %p13_p3 = scmp.ge.s32.totalorder %s693_s18, 4   ;;  %s844_s12 = smov %s634_s13 }
 0x11f   : > { %s845_s13 = smov %s638_s14  ;;  %s846_s14 = smov %s704_s21 }
 0x120   : > { %s847_s15 = smov %s693_s18  ;;  %15 = sbr.rel (!%p13_p3) target bundleno = 3 (0x3), region = 67 }
 0x127   :  { %414 = vsyncpa [#allocation3], 1 }
 0x128   :  { %416 = vsyncpa [#allocation3 + $0x1], 1 }

</bundles_post_ra>
